<compile_context>
chip_gen: v7x
topology: tpu7x:2x2x1
jax: 0.10.0
libtpu: 0.0.40
codegen_flags: <defaults>
</compile_context>

<pallas_src>
import functools

import jax
import jax.numpy as jnp
from jax.experimental import pallas as pl
from jax.experimental.pallas import tpu as pltpu


def _cdiv(a, b):
    return -(-a // b)


def _round_up(a, b):
    return _cdiv(a, b) * b


def _dice_bce_kernel(x_ref, t_ref, out_ref, *, tile_rows, lanes):
    s = pl.program_id(1)  # sequential reduction step within this chunk

    @pl.when(s == 0)
    def _init():
        out_ref[...] = jnp.zeros_like(out_ref)

    x = x_ref[...].astype(jnp.float32)
    t = t_ref[...].astype(jnp.float32)

    # Shared-EUP sigmoid + softplus: one exp, one log, one approx vrcp.
    e = jnp.exp(-jnp.abs(x))                       # exp(-|x|)
    d = 1.0 + e
    inv = pl.reciprocal(d, approx=True)            # ~1 / (1 + exp(-|x|))
    p = jnp.where(x >= 0.0, inv, e * inv)          # sigmoid(x)
    softplus = jnp.maximum(x, 0.0) + jnp.log(d)    # softplus(x)
    ce = softplus - t * x                          # per-element BCE from logits

    def fold_into(row0, v):
        # Fold (tile_rows, lanes) into an (8, lanes) partial with VPU adds only;
        # tiny whole-array blocks (tile_rows not a multiple of 8) fall back to a
        # single cross-sublane reduce into row `row0`.
        if tile_rows >= 8 and tile_rows % 8 == 0:
            out_ref[row0:row0 + 8, :] += jnp.sum(
                v.reshape(tile_rows // 8, 8, lanes), axis=0)
        else:
            out_ref[row0:row0 + 1, :] += jnp.sum(v, axis=0, keepdims=True)

    fold_into(0, p * t)    # intersection
    fold_into(8, p)        # sum(sigmoid(x))
    fold_into(16, t)       # sum(targets)
    fold_into(24, ce)      # sum of per-element BCE terms


def dice_bce_loss(inputs, targets, smooth=1.0):
    """Pallas TPU implementation of DiceBCELoss.forward.

    Note: like the reference PyTorch module, `smooth` is accepted but unused
    (the module clamps the dice denominator at 1e-6 instead of smoothing).
    """
    del smooth
    total = inputs.size
    assert targets.size == total and total > 0

    x = inputs.reshape(-1)
    t = targets.reshape(-1)

    # Lane width: largest power-of-two multiple of 128 dividing `total`, so the
    # (rows, lanes) reshape is free (no HBM copy).
    lanes = None
    for cand in (1024, 512, 256, 128):
        if total % cand == 0:
            lanes = cand
            break
    if lanes is None:
        # Rare fallback (total % 128 != 0): pad with logit=-30 / target=0, which
        # contributes ~1e-13 to every partial sum -> no mask or correction needed.
        lanes = 128
        padded = _round_up(total, lanes)
        x = jnp.pad(x, (0, padded - total), constant_values=-30.0)
        t = jnp.pad(t, (0, padded - total))
    rows = x.size // lanes

    # Block sizing: ~2 MiB f32-equivalent per input per grid step (amortizes the
    # ~0.35us fixed step overhead while keeping in-kernel f32 temporaries well
    # inside v7x's 64 MiB VMEM).  Lanes = full width -> contiguous block DMA.
    target_block_elems = (2 << 20) // 4
    max_tile_rows = max(8, (target_block_elems // lanes) // 8 * 8)

    if rows <= max_tile_rows:
        # Whole array as one block (block dims equal full dims, so the (8,128)
        # divisibility requirement is waived).
        tile_rows, num_par, steps = rows, 1, 1
    else:
        tile_rows = max_tile_rows
        blocks = rows // tile_rows
        # Split across the parallel axis only when it divides evenly; on v7x the
        # two TensorCores each take one chunk, elsewhere it is measured-neutral.
        num_par = 2 if (blocks >= 2 and blocks % 2 == 0) else 1
        steps = blocks // num_par
    rows_kernel = num_par * steps * tile_rows

    x2 = x.reshape(rows, lanes)
    t2 = t.reshape(rows, lanes)

    kernel = functools.partial(_dice_bce_kernel, tile_rows=tile_rows, lanes=lanes)

    # VMEM budget: 2 inputs x 2 pipeline buffers (at input dtype) + ~8 f32
    # tile-sized elementwise temporaries + output + headroom.
    in_bytes = tile_rows * lanes * jnp.dtype(inputs.dtype).itemsize
    tg_bytes = tile_rows * lanes * jnp.dtype(targets.dtype).itemsize
    tmp_bytes = 8 * tile_rows * lanes * 4
    vmem_needed = 2 * (in_bytes + tg_bytes) + tmp_bytes + 2 * 32 * lanes * 4 + (4 << 20)
    vmem_limit = int(min(56 << 20, max(24 << 20, vmem_needed)))

    partials = pl.pallas_call(
        kernel,
        out_shape=jax.ShapeDtypeStruct((num_par * 32, lanes), jnp.float32),
        grid_spec=pltpu.PrefetchScalarGridSpec(
            num_scalar_prefetch=0,
            grid=(num_par, steps),
            in_specs=[
                pl.BlockSpec((tile_rows, lanes), lambda c, s: (c * steps + s, 0)),
                pl.BlockSpec((tile_rows, lanes), lambda c, s: (c * steps + s, 0)),
            ],
            out_specs=pl.BlockSpec((32, lanes), lambda c, s: (c, 0)),
        ),
        compiler_params=pltpu.CompilerParams(
            dimension_semantics=("parallel", "arbitrary"),
            vmem_limit_bytes=vmem_limit),
    )(x2, t2)

    # Tiny cross-lane reduction + scalar epilogue (plain JAX).
    sums = jnp.sum(partials.reshape(num_par, 4, 8, lanes), axis=(0, 2, 3))
    inter, sum_p, sum_t, sum_ce = sums[0], sums[1], sums[2], sums[3]

    # Ragged tail (< one block of rows) not covered by the grid: fold it in with
    # plain JAX instead of padding/copying the whole tensor.
    if rows_kernel < rows:
        xt = x[rows_kernel * lanes:].astype(jnp.float32)
        tt = t[rows_kernel * lanes:].astype(jnp.float32)
        pt = jax.nn.sigmoid(xt)
        ct = jnp.maximum(xt, 0.0) + jnp.log1p(jnp.exp(-jnp.abs(xt))) - tt * xt
        inter = inter + jnp.sum(pt * tt)
        sum_p = sum_p + jnp.sum(pt)
        sum_t = sum_t + jnp.sum(tt)
        sum_ce = sum_ce + jnp.sum(ct)

    dice = 1.0 - 2.0 * inter / jnp.maximum(sum_p + sum_t, jnp.float32(1e-6))
    bce = sum_ce / jnp.float32(total)
    # TODO(synk): torch binary_cross_entropy clamps log at -100; this kernel uses
    # the exact softplus-from-logits value, differing only for saturated probs.
    return dice + bce


def _reference(inputs, targets, smooth=1.0):
    """Plain-JAX reference mirroring the PyTorch DiceBCELoss module."""
    del smooth  # unused by the reference module as well
    p = jax.nn.sigmoid(inputs.astype(jnp.float32)).reshape(-1)
    t = targets.astype(jnp.float32).reshape(-1)
    intersection = jnp.sum(p * t)
    dice = 1.0 - 2.0 * intersection / jnp.maximum(jnp.sum(p) + jnp.sum(t), 1e-6)
    bce = jnp.mean(-(t * jnp.log(p) + (1.0 - t) * jnp.log(1.0 - p)))
    return dice + bce


if __name__ == "__main__":
    key = jax.random.PRNGKey(0)
    k1, k2 = jax.random.split(key)

    # NCHW: batch=2, channels=4, spatial=16x16
    x = jax.random.normal(k1, (2, 4, 16, 16), dtype=jnp.float32)
    tgt = jax.random.bernoulli(k2, p=0.3, shape=(2, 4, 16, 16)).astype(jnp.float32)

    loss = jax.block_until_ready(dice_bce_loss(x, tgt))
    ref = jax.block_until_ready(_reference(x, tgt))
    # Tolerance accounts for the approximate (vrcp) sigmoid denominator.
    assert jnp.allclose(loss, ref, rtol=2e-3, atol=2e-3), (loss, ref)

    print("KERNEL_OK")
</pallas_src>

<mosaic_0001>
module attributes {stable_mosaic.version = 11 : i64} {
  func.func @_dice_bce_kernel(%arg0: i32, %arg1: i32, %arg2: memref<2x1024xf32, #tpu.memory_space<vmem>>, %arg3: memref<2x1024xf32, #tpu.memory_space<vmem>>, %arg4: memref<32x1024xf32, #tpu.memory_space<vmem>>) attributes {dimension_semantics = [#tpu.dimension_semantics<parallel>, #tpu.dimension_semantics<arbitrary>], iteration_bounds = array<i64: 1, 1>, scalar_prefetch = 0 : i64, scratch_operands = 0 : i64, tpu.core_type = #tpu.core_type<tc>, window_params = [{transform_indices = @transform_0, window_bounds = array<i64: 2, 1024>}, {transform_indices = @transform_1, window_bounds = array<i64: 2, 1024>}, {transform_indices = @transform_2, window_bounds = array<i64: 32, 1024>}]} {
    %c0_i32 = arith.constant 0 : i32
    %0 = arith.cmpi eq, %arg1, %c0_i32 : i32
    %1 = arith.extui %0 : i1 to i32
    %c0_i32_0 = arith.constant 0 : i32
    %2 = arith.cmpi ne, %1, %c0_i32_0 : i32
    scf.if %2 {
      %cst_24 = arith.constant 0.000000e+00 : f32
      %43 = vector.broadcast %cst_24 : f32 to vector<32x1024xf32>
      %c0_25 = arith.constant 0 : index
      %c0_26 = arith.constant 0 : index
      %44 = vector.load %arg4[%c0_25, %c0_26] : memref<32x1024xf32, #tpu.memory_space<vmem>>, vector<32x1024xf32>
      tpu.vector_store %arg4[%c0_25, %c0_26], %43 {strides = array<i32>} : memref<32x1024xf32, #tpu.memory_space<vmem>>, vector<32x1024xf32>,
    } else {
    }
    %c0 = arith.constant 0 : index
    %c0_1 = arith.constant 0 : index
    %3 = vector.load %arg2[%c0, %c0_1] : memref<2x1024xf32, #tpu.memory_space<vmem>>, vector<2x1024xf32>
    %c0_2 = arith.constant 0 : index
    %c0_3 = arith.constant 0 : index
    %4 = vector.load %arg3[%c0_2, %c0_3] : memref<2x1024xf32, #tpu.memory_space<vmem>>, vector<2x1024xf32>
    %5 = math.absf %3 : vector<2x1024xf32>
    %cst = arith.constant 0.000000e+00 : f32
    %6 = vector.broadcast %cst : f32 to vector<2x1024xf32>
    %7 = arith.subf %6, %5 : vector<2x1024xf32>
    %8 = math.exp %7 : vector<2x1024xf32>
    %cst_4 = arith.constant 1.000000e+00 : f32
    %9 = vector.broadcast %cst_4 : f32 to vector<2x1024xf32>
    %10 = arith.addf %9, %8 : vector<2x1024xf32>
    %11 = tpu.reciprocal %10 {approx = true} : vector<2x1024xf32> -> vector<2x1024xf32>
    %cst_5 = arith.constant 0.000000e+00 : f32
    %12 = vector.broadcast %cst_5 : f32 to vector<2x1024xf32>
    %13 = arith.cmpf oge, %3, %12 : vector<2x1024xf32>
    %14 = arith.mulf %8, %11 : vector<2x1024xf32>
    %15 = arith.select %13, %11, %14 : vector<2x1024xi1>, vector<2x1024xf32>
    %cst_6 = arith.constant 0.000000e+00 : f32
    %16 = vector.broadcast %cst_6 : f32 to vector<2x1024xf32>
    %17 = arith.maximumf %3, %16 : vector<2x1024xf32>
    %18 = math.log %10 : vector<2x1024xf32>
    %19 = arith.addf %17, %18 : vector<2x1024xf32>
    %20 = arith.mulf %4, %3 : vector<2x1024xf32>
    %21 = arith.subf %19, %20 : vector<2x1024xf32>
    %22 = arith.mulf %15, %4 : vector<2x1024xf32>
    %c0_7 = arith.constant 0 : index
    %c0_8 = arith.constant 0 : index
    %23 = vector.load %arg4[%c0_7, %c0_8] : memref<32x1024xf32, #tpu.memory_space<vmem>>, vector<1x1024xf32>
    %cst_9 = arith.constant dense<0.000000e+00> : vector<1024xf32>
    %24 = vector.multi_reduction <add>, %22, %cst_9 [0] : vector<2x1024xf32> to vector<1024xf32>
    %25 = vector.shape_cast %24 : vector<1024xf32> to vector<1x1024xf32>
    %26 = arith.addf %23, %25 : vector<1x1024xf32>
    %c0_10 = arith.constant 0 : index
    %c0_11 = arith.constant 0 : index
    %27 = vector.load %arg4[%c0_10, %c0_11] : memref<32x1024xf32, #tpu.memory_space<vmem>>, vector<1x1024xf32>
    tpu.vector_store %arg4[%c0_10, %c0_11], %26 {strides = array<i32>} : memref<32x1024xf32, #tpu.memory_space<vmem>>, vector<1x1024xf32>,
    %c8 = arith.constant 8 : index
    %c0_12 = arith.constant 0 : index
    %28 = vector.load %arg4[%c8, %c0_12] : memref<32x1024xf32, #tpu.memory_space<vmem>>, vector<1x1024xf32>
    %cst_13 = arith.constant dense<0.000000e+00> : vector<1024xf32>
    %29 = vector.multi_reduction <add>, %15, %cst_13 [0] : vector<2x1024xf32> to vector<1024xf32>
    %30 = vector.shape_cast %29 : vector<1024xf32> to vector<1x1024xf32>
    %31 = arith.addf %28, %30 : vector<1x1024xf32>
    %c8_14 = arith.constant 8 : index
    %c0_15 = arith.constant 0 : index
    %32 = vector.load %arg4[%c8_14, %c0_15] : memref<32x1024xf32, #tpu.memory_space<vmem>>, vector<1x1024xf32>
    tpu.vector_store %arg4[%c8_14, %c0_15], %31 {strides = array<i32>} : memref<32x1024xf32, #tpu.memory_space<vmem>>, vector<1x1024xf32>,
    %c16 = arith.constant 16 : index
    %c0_16 = arith.constant 0 : index
    %33 = vector.load %arg4[%c16, %c0_16] : memref<32x1024xf32, #tpu.memory_space<vmem>>, vector<1x1024xf32>
    %cst_17 = arith.constant dense<0.000000e+00> : vector<1024xf32>
    %34 = vector.multi_reduction <add>, %4, %cst_17 [0] : vector<2x1024xf32> to vector<1024xf32>
    %35 = vector.shape_cast %34 : vector<1024xf32> to vector<1x1024xf32>
    %36 = arith.addf %33, %35 : vector<1x1024xf32>
    %c16_18 = arith.constant 16 : index
    %c0_19 = arith.constant 0 : index
    %37 = vector.load %arg4[%c16_18, %c0_19] : memref<32x1024xf32, #tpu.memory_space<vmem>>, vector<1x1024xf32>
    tpu.vector_store %arg4[%c16_18, %c0_19], %36 {strides = array<i32>} : memref<32x1024xf32, #tpu.memory_space<vmem>>, vector<1x1024xf32>,
    %c24 = arith.constant 24 : index
    %c0_20 = arith.constant 0 : index
    %38 = vector.load %arg4[%c24, %c0_20] : memref<32x1024xf32, #tpu.memory_space<vmem>>, vector<1x1024xf32>
    %cst_21 = arith.constant dense<0.000000e+00> : vector<1024xf32>
    %39 = vector.multi_reduction <add>, %21, %cst_21 [0] : vector<2x1024xf32> to vector<1024xf32>
    %40 = vector.shape_cast %39 : vector<1024xf32> to vector<1x1024xf32>
    %41 = arith.addf %38, %40 : vector<1x1024xf32>
    %c24_22 = arith.constant 24 : index
    %c0_23 = arith.constant 0 : index
    %42 = vector.load %arg4[%c24_22, %c0_23] : memref<32x1024xf32, #tpu.memory_space<vmem>>, vector<1x1024xf32>
    tpu.vector_store %arg4[%c24_22, %c0_23], %41 {strides = array<i32>} : memref<32x1024xf32, #tpu.memory_space<vmem>>, vector<1x1024xf32>,
    return
  }
  func.func @transform_0(%arg0: i32, %arg1: i32) -> (i32, i32) {
    %c1_i32 = arith.constant 1 : i32
    %0 = arith.muli %arg0, %c1_i32 : i32
    %1 = arith.addi %0, %arg1 : i32
    %c0_i32 = arith.constant 0 : i32
    %c0_i32_0 = arith.constant 0 : i32
    return %1, %c0_i32 : i32, i32
  }
  func.func @transform_1(%arg0: i32, %arg1: i32) -> (i32, i32) {
    %c1_i32 = arith.constant 1 : i32
    %0 = arith.muli %arg0, %c1_i32 : i32
    %1 = arith.addi %0, %arg1 : i32
    %c0_i32 = arith.constant 0 : i32
    %c0_i32_0 = arith.constant 0 : i32
    return %1, %c0_i32 : i32, i32
  }
  func.func @transform_2(%arg0: i32, %arg1: i32) -> (i32, i32) {
    %c0_i32 = arith.constant 0 : i32
    %c0_i32_0 = arith.constant 0 : i32
    return %arg0, %c0_i32 : i32, i32
  }
}

</mosaic_0001>

<bundles_post_ra>
// kernel: tpu_custom_call.1
= control target key start
LH: loop header
LB: loop body
LE: loop exit
PB: predicated region body
PF: predicated region fallthrough
CT: control target
= control target key end

     0   :  { %7 = vsyncpa [#allocation3], 0  ;;  %s1123_s0 = inlined_call_operand.hbm [shape: f32[2,1024], index: 0, kind: input, shape index: {}]   ;;  %s1124_s1 = inlined_call_operand.hbm [shape: f32[2,1024], index: 1, kind: input, shape index: {}]   ;;  %s1125_s2 = inlined_call_operand.hbm [shape: f32[32,1024], index: 2, kind: output, shape index: {}]  }
   0x1   :  { %8 = vsyncpa [#allocation6], 0 }
   0x2   :  { %9 = vsyncpa [#allocation4], 0  ;;  %s888_s9 = smov [#allocation2]   ;;  %s889_s11 = smov [#allocation5]  }
   0x3   :  { %s20_s10 = sshll.u32 %s888_s9, 4  ;;  %s34_s12 = sshll.u32 %s889_s11, 4  ;;  %s21_s10 = int_to_ptr.vmem [resolvable:$true] %s20_s10  ;;  %s35_s12 = int_to_ptr.vmem [resolvable:$true] %s34_s12 }
   0x4   :  { %s816_s15 = scalar_lea.hbm %s1123_s0, 256 }
   0x5   :  { %p817_p0 = scmp.ne.s32.totalorder %s1123_s0, %s816_s15  ;;  %p820_p1 = scmp.lt.u32.totalorder %s816_s15, %s1123_s0 }
   0x7   :  { %p822_p2 = pnand %p820_p1, %p817_p0 }
   0x9   :  { %825 = shalt.err (!%p822_p2)
}
   0xa   :  { %s826_s20 = scalar_lea.vmem %s21_s10, 256  ;;  %p831_p4 = scmp.lt.s32.totalorder %s21_s10, %s21_s10 }
   0xb   :  { %p827_p3 = scmp.ne.s32.totalorder %s21_s10, %s826_s20  ;;  %p832_p5 = scmp.lt.s32.totalorder %s826_s20, %s826_s20 }
   0xd   :  { %p833_p6 = por %p832_p5, %p831_p4 }
   0xf   :  { %p834_p7 = pnand %p833_p6, %p827_p3 }
  0x11   :  { %837 = shalt.err (!%p834_p7)
}
  0x12   :  { %23 = dma.hbm_to_vmem [thread:$0]  %s1123_s0, 256, %s21_s10, [#allocation3]  }
  0x13   :  { %s838_s25 = scalar_lea.hbm %s1124_s1, 256 }
  0x14   :  { %p839_p8 = scmp.ne.s32.totalorder %s1124_s1, %s838_s25  ;;  %p842_p9 = scmp.lt.u32.totalorder %s838_s25, %s1124_s1 }
  0x16   :  { %p844_p10 = pnand %p842_p9, %p839_p8 }
  0x18   :  { %847 = shalt.err (!%p844_p10)
}
  0x19   :  { %s848_s30 = scalar_lea.vmem %s35_s12, 256  ;;  %p853_p12 = scmp.lt.s32.totalorder %s35_s12, %s35_s12 }
  0x1a   :  { %p849_p11 = scmp.ne.s32.totalorder %s35_s12, %s848_s30  ;;  %p854_p13 = scmp.lt.s32.totalorder %s848_s30, %s848_s30 }
  0x1c   :  { %p855_p0 = por %p854_p13, %p853_p12 }
  0x1e   :  { %p856_p1 = pnand %p855_p0, %p849_p11 }
  0x20   :  { %859 = shalt.err (!%p856_p1)
}
  0x21   :  { %37 = dma.hbm_to_vmem [thread:$0]  %s1124_s1, 256, %s35_s12, [#allocation6]  }
  0x22   :  { %882 = dma.done.wait [#allocation3], 256  }
  0x23   :  { %883 = vsyncadd [#allocation3], 4294967040 }
  0x24   :  { %884 = dma.done.wait [#allocation6], 256  }
  0x25   :  { %885 = vsyncadd [#allocation6], 4294967040  ;;  %v127_v0 = vlaneseq  ;;  %v890_v1 = vmov 0.0   ;;  %v891_v2 = vmov 1983009808   ;;  %v937_v9 = vld [vmem:[#allocation2] sm:$0xff] }
  0x26   :  { %50 = vst [vmem:[#allocation7] sm:$0xff] %v890_v1  ;;  %51 = vst [vmem:[#allocation7 + $0x8] sm:$0xff] %v890_v1  ;;  %v125_v3 = vunpack.c.l.s4 %v891_v2  ;;  %v892_v7 = vmov 1966171168   ;;  %v939_v10 = vld [vmem:[#allocation2 + $0x8] sm:$0xff]  ;;  %v941_v11 = vld [vmem:[#allocation5] sm:$0xff] }
  0x27   :  { %52 = vst [vmem:[#allocation7 + $0x10] sm:$0xff] %v890_v1  ;;  %53 = vst [vmem:[#allocation7 + $0x18] sm:$0xff] %v890_v1  ;;  %v128_v4 = vshrl.u32 %v127_v0, 7  ;;  %v235_v8 = vunpack.c.l.s4 %v892_v7  ;;  %v943_v12 = vld [vmem:[#allocation5 + $0x8] sm:$0xff]  ;;  %v86_v13 = vand.u32 2147483647, %v937_v9  ;;  %v454_v15 = vcombine.high %v941_v11, %v941_v11 }
  0x28   :  { %54 = vst [vmem:[#allocation7 + $0x20] sm:$0xff] %v890_v1  ;;  %55 = vst [vmem:[#allocation7 + $0x28] sm:$0xff] %v890_v1  ;;  %v126_v5 = vunpack.c.0.s8 %v125_v3  ;;  %v87_v14 = vand.u32 2147483647, %v939_v10  ;;  %v471_v18 = vcombine.high %v943_v12, %v943_v12  ;;  %vm165_vm0 = vcmask 1041408   ;;  %s893_s1 = smov [#allocation7]  }
  0x29   :  { %56 = vst [vmem:[#allocation7 + $0x30] sm:$0xff] %v890_v1  ;;  %57 = vst [vmem:[#allocation7 + $0x38] sm:$0xff] %v890_v1  ;;  %v236_v16 = vunpack.c.0.s8 %v235_v8  ;;  %v88_v20 = vsub.f32 0.0, %v86_v13  ;;  %vm98_vm1 = vcmp.ge.f32.partialorder %v937_v9, 0.0  ;;  %vm99_vm2 = vcmp.ge.f32.partialorder %v939_v10, 0.0  ;;  %s783_s4 = sshll.u32 %s893_s1, 4  ;;  %s784_s4 = int_to_ptr.vmem [resolvable:$true] %s783_s4 }
  0x2a   :  { %58 = vst [vmem:[#allocation7 + $0x40] sm:$0xff] %v890_v1  ;;  %59 = vst [vmem:[#allocation7 + $0x48] sm:$0xff] %v890_v1  ;;  %v935_v6 = vsub.s32 %v126_v5, %v128_v4  ;;  %v89_v21 = vsub.f32 0.0, %v87_v14  ;;  %s860_s5 = scalar_lea.vmem %s784_s4, 4096  ;;  %p865_p3 = scmp.lt.s32.totalorder %s784_s4, %s784_s4 }
  0x2b   :  { %60 = vst [vmem:[#allocation7 + $0x50] sm:$0xff] %v890_v1  ;;  %61 = vst [vmem:[#allocation7 + $0x58] sm:$0xff] %v890_v1  ;;  %v90_v25 = vmul.f32 1.442695, %v88_v20  ;;  %v957_v29 = vsub.s32 %v236_v16, %v128_v4  ;;  %p861_p2 = scmp.ne.s32.totalorder %s784_s4, %s860_s5  ;;  %p866_p4 = scmp.lt.s32.totalorder %s860_s5, %s860_s5 }
  0x2c   :  { %62 = vst [vmem:[#allocation7 + $0x60] sm:$0xff] %v890_v1  ;;  %63 = vst [vmem:[#allocation7 + $0x68] sm:$0xff] %v890_v1  ;;  %v461_v17 = vrot.slane %v941_v11, %v935_v6  ;;  %v478_v19 = vrot.slane %v943_v12, %v935_v6  ;;  %v468_v22 = vrot.slane %v454_v15, %v935_v6  ;;  %v92_v26 = vmul.f32 1.442695, %v89_v21 }
  0x2d   :  { %64 = vst [vmem:[#allocation7 + $0x70] sm:$0xff] %v890_v1  ;;  %65 = vst [vmem:[#allocation7 + $0x78] sm:$0xff] %v890_v1  ;;  %v485_v24 = vrot.slane %v471_v18, %v935_v6  ;;  %804 = vpow2.f32 %v90_v25  ;;  %p867_p5 = por %p866_p4, %p865_p3 }
  0x2e   :  { %66 = vst [vmem:[#allocation7 + $0x80] sm:$0xff] %v890_v1  ;;  %67 = vst [vmem:[#allocation7 + $0x88] sm:$0xff] %v890_v1  ;;  %v469_v23 = vcombine.high %v461_v17, %v461_v17  ;;  %v470_v27 = vcombine.high %v468_v22, %v468_v22  ;;  %v486_v28 = vcombine.high %v478_v19, %v478_v19  ;;  %v496_v31 = vsel %vm165_vm0, %v461_v17, 0.0 }
  0x2f   :  { %68 = vst [vmem:[#allocation7 + $0x90] sm:$0xff] %v890_v1  ;;  %69 = vst [vmem:[#allocation7 + $0x98] sm:$0xff] %v890_v1  ;;  %v487_v30 = vcombine.high %v485_v24, %v485_v24  ;;  %806 = vpow2.f32 %v92_v26  ;;  %v497_v33 = vrot.slane %v496_v31, 4  ;;  %v510_v35 = vsel %vm165_vm0, %v468_v22, 0.0  ;;  %p868_p6 = pnand %p867_p5, %p861_p2 }
  0x30   :  { %70 = vst [vmem:[#allocation7 + $0xa0] sm:$0xff] %v890_v1  ;;  %71 = vst [vmem:[#allocation7 + $0xa8] sm:$0xff] %v890_v1  ;;  %v503_v32 = vsel %vm165_vm0, %v469_v23, 0.0  ;;  %v511_v36 = vrot.slane %v510_v35, 4  ;;  %v517_v37 = vsel %vm165_vm0, %v470_v27, 0.0  ;;  %v524_v38 = vsel %vm165_vm0, %v478_v19, 0.0 }
  0x31   :  { %72 = vst [vmem:[#allocation7 + $0xb0] sm:$0xff] %v890_v1  ;;  %73 = vst [vmem:[#allocation7 + $0xb8] sm:$0xff] %v890_v1  ;;  %v504_v34 = vrot.slane %v503_v32, 4  ;;  %v531_v39 = vsel %vm165_vm0, %v486_v28, 0.0  ;;  %v498_v40 = vadd.f32 %v497_v33, %v496_v31  ;;  %v518_v42 = vrot.slane %v517_v37, 4 }
  0x32   :  { %74 = vst [vmem:[#allocation7 + $0xc0] sm:$0xff] %v890_v1  ;;  %75 = vst [vmem:[#allocation7 + $0xc8] sm:$0xff] %v890_v1  ;;  %v525_v43 = vrot.slane %v524_v38, 4  ;;  %v512_v44 = vadd.f32 %v511_v36, %v510_v35  ;;  %v532_v45 = vrot.slane %v531_v39, 4  ;;  %v538_v46 = vsel %vm165_vm0, %v485_v24, 0.0 }
  0x33   :  { %76 = vst [vmem:[#allocation7 + $0xd0] sm:$0xff] %v890_v1  ;;  %77 = vst [vmem:[#allocation7 + $0xd8] sm:$0xff] %v890_v1  ;;  %v505_v41 = vadd.f32 %v504_v34, %v503_v32  ;;  %v545_v47 = vsel %vm165_vm0, %v487_v30, 0.0  ;;  %v499_v48 = vrot.slane %v498_v40, 2  ;;  %v519_v50 = vadd.f32 %v518_v42, %v517_v37 }
  0x34   :  { %78 = vst [vmem:[#allocation7 + $0xe0] sm:$0xff] %v890_v1  ;;  %79 = vst [vmem:[#allocation7 + $0xe8] sm:$0xff] %v890_v1  ;;  %v526_v51 = vadd.f32 %v525_v43, %v524_v38  ;;  %v513_v52 = vrot.slane %v512_v44, 2  ;;  %v533_v53 = vadd.f32 %v532_v45, %v531_v39  ;;  %v539_v54 = vrot.slane %v538_v46, 4 }
  0x35   :  { %80 = vst [vmem:[#allocation7 + $0xf0] sm:$0xff] %v890_v1  ;;  %81 = vst [vmem:[#allocation7 + $0xf8] sm:$0xff] %v890_v1  ;;  %v506_v49 = vrot.slane %v505_v41, 2  ;;  %v546_v55 = vrot.slane %v545_v47, 4  ;;  %v500_v56 = vadd.f32 %v499_v48, %v498_v40  ;;  %v520_v58 = vrot.slane %v519_v50, 2 }
  0x36   :  { %v527_v59 = vrot.slane %v526_v51, 2  ;;  %v514_v60 = vadd.f32 %v513_v52, %v512_v44  ;;  %v534_v61 = vrot.slane %v533_v53, 2  ;;  %v540_v62 = vadd.f32 %v539_v54, %v538_v46  ;;  %v972_v42 = vld [vmem:[#allocation7] ss:$8 sm:$0xf0] }
  0x37   :  { %v507_v57 = vadd.f32 %v506_v49, %v505_v41  ;;  %v547_v63 = vadd.f32 %v546_v55, %v545_v47  ;;  %v501_v0 = vrot.slane %v500_v56, 1  ;;  %v521_v2 = vadd.f32 %v520_v58, %v519_v50  ;;  %v805_v4 = vpop.eup %804  ;;  %v970_v41 = vld [vmem:[#allocation7] ss:$8 sm:$0xf] }
  0x38   :  { %v528_v3 = vadd.f32 %v527_v59, %v526_v51  ;;  %v515_v5 = vrot.slane %v514_v60, 1  ;;  %v535_v7 = vadd.f32 %v534_v61, %v533_v53  ;;  %v541_v8 = vrot.slane %v540_v62, 2  ;;  %v977_v45 = vld [vmem:[#allocation7 + $0x80] ss:$8 sm:$0xf] }
  0x39   :  { %v508_v1 = vrot.slane %v507_v57, 1  ;;  %v548_v13 = vrot.slane %v547_v63, 2  ;;  %v807_v14 = vpop.eup %806  ;;  %v94_v15 = vadd.f32 1.0, %v805_v4  ;;  %v502_v16 = vadd.f32 %v501_v0, %v500_v56  ;;  %v979_v46 = vld [vmem:[#allocation7 + $0x80] ss:$8 sm:$0xf0] }
  0x3a   :  { %v522_v18 = vrot.slane %v521_v2, 1  ;;  %v95_v19 = vadd.f32 1.0, %v807_v14  ;;  %v516_v20 = vadd.f32 %v515_v5, %v514_v60  ;;  %v529_v21 = vrot.slane %v528_v3, 1 }
  0x3b   :  { %v509_v17 = vadd.f32 %v508_v1, %v507_v57  ;;  %v536_v22 = vrot.slane %v535_v7, 1  ;;  %808 = vrcp.f32 %v94_v15  ;;  %v542_v24 = vadd.f32 %v541_v8, %v540_v62 }
  0x3c   :  { %v523_v23 = vadd.f32 %v522_v18, %v521_v2  ;;  %v549_v25 = vadd.f32 %v548_v13, %v547_v63  ;;  %810 = vrcp.f32 %v95_v19  ;;  %v530_v26 = vadd.f32 %v529_v21, %v528_v3 }
  0x3d   :  { %v537_v27 = vadd.f32 %v536_v22, %v535_v7  ;;  %v560_v28 = vcombine.low %v502_v16, %v509_v17  ;;  %v543_v30 = vrot.slane %v542_v24, 1  ;;  %v120_v50 = vor.u32 %v972_v42, %v970_v41 }
  0x3e   :  { %v550_v31 = vrot.slane %v549_v25, 1  ;;  %v561_v32 = vcombine.low %v516_v20, %v523_v23  ;;  %v104_v52 = vmax.f32 %v937_v9, 0.0  ;;  %812 = vlog2.f32 %v94_v15 }
  0x3f   :  { %v562_v33 = vcombine.low %v530_v26, %v537_v27  ;;  %v570_v34 = vrot.slane %v560_v28, %v957_v29  ;;  %v544_v35 = vadd.f32 %v543_v30, %v542_v24  ;;  %v992_v55 = vmul.f32 %v941_v11, %v937_v9 }
  0x40   :  { %v551_v36 = vadd.f32 %v550_v31, %v549_v25  ;;  %v577_v37 = vrot.slane %v561_v32, %v957_v29  ;;  %v451_v57 = vor.u32 %v979_v46, %v977_v45  ;;  %v105_v58 = vmax.f32 %v939_v10, 0.0 }
  0x41   :  { %v584_v39 = vrot.slane %v562_v33, %v957_v29  ;;  %814 = vlog2.f32 %v95_v19 }
  0x42   :  { %v563_v38 = vcombine.low %v544_v35, %v551_v36  ;;  %v592_v40 = vcombine.low %v570_v34, %v577_v37 }
  0x44   :  { %v591_v43 = vrot.slane %v563_v38, %v957_v29  ;;  %v984_v51 = vrot.slane %v592_v40, %v957_v29 }
  0x45   :  { %v809_v44 = vpop.eup %808 }
  0x46   :  { %v593_v47 = vcombine.low %v584_v39, %v591_v43  ;;  %v811_v48 = vpop.eup %810  ;;  %v100_v49 = vmul.f32 %v809_v44, %v805_v4 }
  0x47   :  { %v101_v53 = vmul.f32 %v811_v48, %v807_v14 }
  0x48   :  { %v988_v54 = vrot.slane %v593_v47, %v957_v29  ;;  %v102_v56 = vsel %vm98_vm1, %v809_v44, %v100_v49  ;;  %v1029_v32 = vpop.eup %812 }
  0x49   :  { %v103_v59 = vsel %vm99_vm2, %v811_v48, %v101_v53  ;;  %v116_v60 = vmul.f32 %v102_v56, %v941_v11  ;;  %v289_v61 = vcombine.high %v102_v56, %v102_v56  ;;  %v1001_v62 = vrot.slane %v102_v56, %v935_v6 }
  0x4a   :  { %v117_v63 = vmul.f32 %v103_v59, %v943_v12  ;;  %v306_v0 = vcombine.high %v103_v59, %v103_v59  ;;  %v1005_v1 = vrot.slane %v103_v59, %v935_v6  ;;  %v608_v2 = vcombine.low %v984_v51, %v988_v54  ;;  %v1080_v54 = vld [vmem:[#allocation7 + $0x40] ss:$8 sm:$0xf] }
  0x4b   :  { %v123_v3 = vcombine.high %v116_v60, %v116_v60  ;;  %v130_v4 = vrot.slane %v116_v60, %v935_v6  ;;  %v1011_v5 = vrot.slane %v289_v61, %v935_v6  ;;  %v304_v11 = vcombine.high %v1001_v62, %v1001_v62  ;;  %v1034_v37 = vpop.eup %814 }
  0x4c   :  { %v140_v7 = vcombine.high %v117_v63, %v117_v63  ;;  %v147_v8 = vrot.slane %v117_v63, %v935_v6  ;;  %v1017_v13 = vrot.slane %v306_v0, %v935_v6  ;;  %v321_v14 = vcombine.high %v1005_v1, %v1005_v1 }
  0x4d   :  { %v137_v15 = vrot.slane %v123_v3, %v935_v6  ;;  %v138_v16 = vcombine.high %v130_v4, %v130_v4  ;;  %v166_v17 = vsel %vm165_vm0, %v130_v4, 0.0  ;;  %v305_v18 = vcombine.high %v1011_v5, %v1011_v5 }
  0x4e   :  { %v154_v19 = vrot.slane %v140_v7, %v935_v6  ;;  %v155_v20 = vcombine.high %v147_v8, %v147_v8  ;;  %v167_v21 = vrot.slane %v166_v17, 4  ;;  %v194_v22 = vsel %vm165_vm0, %v147_v8, 0.0 }
  0x4f   :  { %v139_v23 = vcombine.high %v137_v15, %v137_v15  ;;  %v173_v24 = vsel %vm165_vm0, %v138_v16, 0.0  ;;  %v180_v25 = vsel %vm165_vm0, %v137_v15, 0.0  ;;  %v195_v26 = vrot.slane %v194_v22, 4 }
  0x50   :  { %v156_v27 = vcombine.high %v154_v19, %v154_v19  ;;  %v168_v28 = vadd.f32 %v167_v21, %v166_v17  ;;  %v174_v30 = vrot.slane %v173_v24, 4  ;;  %v181_v31 = vrot.slane %v180_v25, 4 }
  0x51   :  { %v187_v33 = vsel %vm165_vm0, %v139_v23, 0.0  ;;  %v196_v34 = vadd.f32 %v195_v26, %v194_v22  ;;  %v201_v35 = vsel %vm165_vm0, %v155_v20, 0.0  ;;  %v208_v36 = vsel %vm165_vm0, %v154_v19, 0.0 }
  0x52   :  { %v169_v38 = vrot.slane %v168_v28, 2  ;;  %v175_v39 = vadd.f32 %v174_v30, %v173_v24  ;;  %v182_v40 = vadd.f32 %v181_v31, %v180_v25  ;;  %v188_v43 = vrot.slane %v187_v33, 4 }
  0x53   :  { %v197_v44 = vrot.slane %v196_v34, 2  ;;  %v202_v47 = vrot.slane %v201_v35, 4  ;;  %v209_v48 = vrot.slane %v208_v36, 4  ;;  %v215_v49 = vsel %vm165_vm0, %v156_v27, 0.0 }
  0x54   :  { %v170_v53 = vadd.f32 %v169_v38, %v168_v28  ;;  %v176_v56 = vrot.slane %v175_v39, 2  ;;  %v183_v59 = vrot.slane %v182_v40, 2  ;;  %v189_v60 = vadd.f32 %v188_v43, %v187_v33 }
  0x55   :  { %v198_v61 = vadd.f32 %v197_v44, %v196_v34  ;;  %v203_v63 = vadd.f32 %v202_v47, %v201_v35  ;;  %v210_v0 = vadd.f32 %v209_v48, %v208_v36  ;;  %v216_v3 = vrot.slane %v215_v49, 4 }
  0x56   :  { %v171_v4 = vrot.slane %v170_v53, 1  ;;  %v177_v7 = vadd.f32 %v176_v56, %v175_v39  ;;  %v184_v8 = vadd.f32 %v183_v59, %v182_v40  ;;  %v190_v15 = vrot.slane %v189_v60, 2 }
  0x57   :  { %v199_v16 = vrot.slane %v198_v61, 1  ;;  %v204_v17 = vrot.slane %v203_v63, 2  ;;  %v211_v19 = vrot.slane %v210_v0, 2  ;;  %v217_v20 = vadd.f32 %v216_v3, %v215_v49 }
  0x58   :  { %v172_v21 = vadd.f32 %v171_v4, %v170_v53  ;;  %v178_v22 = vrot.slane %v177_v7, 1  ;;  %v185_v23 = vrot.slane %v184_v8, 1  ;;  %v191_v24 = vadd.f32 %v190_v15, %v189_v60 }
  0x59   :  { %v200_v25 = vadd.f32 %v199_v16, %v198_v61  ;;  %v205_v26 = vadd.f32 %v204_v17, %v203_v63  ;;  %v212_v27 = vadd.f32 %v211_v19, %v210_v0  ;;  %v218_v28 = vrot.slane %v217_v20, 2 }
  0x5a   :  { %v179_v30 = vadd.f32 %v178_v22, %v177_v7  ;;  %v186_v31 = vadd.f32 %v185_v23, %v184_v8  ;;  %v192_v33 = vrot.slane %v191_v24, 1  ;;  %v322_v34 = vcombine.high %v1017_v13, %v1017_v13 }
  0x5b   :  { %v206_v35 = vrot.slane %v205_v26, 1  ;;  %v213_v36 = vrot.slane %v212_v27, 1  ;;  %v219_v38 = vadd.f32 %v218_v28, %v217_v20  ;;  %v331_v39 = vsel %vm165_vm0, %v1001_v62, 0.0 }
  0x5c   :  { %v193_v40 = vadd.f32 %v192_v33, %v191_v24  ;;  %v230_v43 = vcombine.low %v172_v21, %v179_v30  ;;  %v332_v44 = vrot.slane %v331_v39, 4  ;;  %v338_v47 = vsel %vm165_vm0, %v304_v11, 0.0 }
  0x5d   :  { %v207_v48 = vadd.f32 %v206_v35, %v205_v26  ;;  %v214_v49 = vadd.f32 %v213_v36, %v212_v27  ;;  %v220_v53 = vrot.slane %v219_v38, 1  ;;  %v339_v56 = vrot.slane %v338_v47, 4 }
  0x5e   :  { %v231_v59 = vcombine.low %v186_v31, %v193_v40  ;;  %v240_v60 = vrot.slane %v230_v43, %v957_v29  ;;  %v333_v61 = vadd.f32 %v332_v44, %v331_v39  ;;  %v345_v63 = vsel %vm165_vm0, %v1011_v5, 0.0 }
  0x5f   :  { %v221_v0 = vadd.f32 %v220_v53, %v219_v38  ;;  %v232_v3 = vcombine.low %v200_v25, %v207_v48  ;;  %v340_v4 = vadd.f32 %v339_v56, %v338_v47  ;;  %v346_v7 = vrot.slane %v345_v63, 4 }
  0x60   :  { %v247_v8 = vrot.slane %v231_v59, %v957_v29  ;;  %v334_v62 = vrot.slane %v333_v61, 2  ;;  %v352_v11 = vsel %vm165_vm0, %v305_v18, 0.0  ;;  %v359_v15 = vsel %vm165_vm0, %v1005_v1, 0.0 }
  0x61   :  { %v233_v16 = vcombine.low %v214_v49, %v221_v0  ;;  %v254_v17 = vrot.slane %v232_v3, %v957_v29  ;;  %v341_v19 = vrot.slane %v340_v4, 2  ;;  %v347_v20 = vadd.f32 %v346_v7, %v345_v63 }
  0x62   :  { %v262_v21 = vcombine.low %v240_v60, %v247_v8  ;;  %v335_v22 = vadd.f32 %v334_v62, %v333_v61  ;;  %v353_v23 = vrot.slane %v352_v11, 4  ;;  %v360_v24 = vrot.slane %v359_v15, 4 }
  0x63   :  { %v261_v25 = vrot.slane %v233_v16, %v957_v29  ;;  %v342_v26 = vadd.f32 %v341_v19, %v340_v4  ;;  %v348_v27 = vrot.slane %v347_v20, 2  ;;  %v366_v5 = vsel %vm165_vm0, %v321_v14, 0.0 }
  0x64   :  { %v270_v18 = vrot.slane %v262_v21, %v957_v29  ;;  %v336_v28 = vrot.slane %v335_v22, 1  ;;  %v354_v30 = vadd.f32 %v353_v23, %v352_v11  ;;  %v361_v31 = vadd.f32 %v360_v24, %v359_v15 }
  0x65   :  { %v263_v33 = vcombine.low %v254_v17, %v261_v25  ;;  %v343_v35 = vrot.slane %v342_v26, 1  ;;  %v349_v36 = vadd.f32 %v348_v27, %v347_v20  ;;  %v367_v38 = vrot.slane %v366_v5, 4 }
  0x66   :  { %v337_v39 = vadd.f32 %v336_v28, %v335_v22  ;;  %v355_v40 = vrot.slane %v354_v30, 2  ;;  %v362_v43 = vrot.slane %v361_v31, 2  ;;  %v373_v44 = vsel %vm165_vm0, %v1017_v13, 0.0  ;;  %v285_v22 = vld [vmem:[#allocation7 + $0x40] ss:$8 sm:$0xf0] }
  0x67   :  { %v277_v47 = vrot.slane %v263_v33, %v957_v29  ;;  %v344_v1 = vadd.f32 %v343_v35, %v342_v26  ;;  %v350_v48 = vrot.slane %v349_v36, 1  ;;  %v368_v14 = vadd.f32 %v367_v38, %v366_v5 }
  0x68   :  { %v356_v49 = vadd.f32 %v355_v40, %v354_v30  ;;  %v363_v53 = vadd.f32 %v362_v43, %v361_v31  ;;  %v374_v56 = vrot.slane %v373_v44, 4  ;;  %v380_v59 = vsel %vm165_vm0, %v322_v34, 0.0 }
  0x69   :  { %v278_v60 = vcombine.low %v270_v18, %v277_v47  ;;  %v351_v61 = vadd.f32 %v350_v48, %v349_v36  ;;  %v369_v63 = vrot.slane %v368_v14, 2  ;;  %v381_v0 = vrot.slane %v380_v59, 4 }
  0x6a   :  { %v357_v3 = vrot.slane %v356_v49, 1  ;;  %v364_v4 = vrot.slane %v363_v53, 1  ;;  %v375_v7 = vadd.f32 %v374_v56, %v373_v44  ;;  %v395_v8 = vcombine.low %v337_v39, %v344_v1 }
  0x6b   :  { %v280_v13 = vadd.f32 %v278_v60, %v120_v50  ;;  %v370_v62 = vadd.f32 %v369_v63, %v368_v14  ;;  %v382_v11 = vadd.f32 %v381_v0, %v380_v59  ;;  %v610_v34 = vadd.f32 %v608_v2, %v451_v57 }
  0x6c   :  { %v358_v15 = vadd.f32 %v357_v3, %v356_v49  ;;  %v365_v16 = vadd.f32 %v364_v4, %v363_v53  ;;  %v376_v17 = vrot.slane %v375_v7, 2  ;;  %v113_v19 = vmul.f32 %v943_v12, %v939_v10 }
  0x6d   :  { %281 = vst [vmem:[#allocation7] ss:$8 sm:$0xf] %v280_v13  ;;  %282 = vst [vmem:[#allocation7] ss:$8 sm:$0xf0] %v280_v13  ;;  %v405_v51 = vrot.slane %v395_v8, %v957_v29  ;;  %v286_v18 = vor.u32 %v285_v22, %v1080_v54 }
  0x6e   :  { %v371_v20 = vrot.slane %v370_v62, 1  ;;  %v383_v41 = vrot.slane %v382_v11, 2  ;;  %611 = vst [vmem:[#allocation7 + $0x80] ss:$8 sm:$0xf] %v610_v34  ;;  %v377_v46 = vadd.f32 %v376_v17, %v375_v7  ;;  %v396_v50 = vcombine.low %v351_v61, %v358_v15 }
  0x6f   :  { %612 = vst [vmem:[#allocation7 + $0x80] ss:$8 sm:$0xf0] %v610_v34  ;;  %v107_v42 = vmul.f32 0.6931472, %v1029_v32 }
  0x70   :  { %v109_v45 = vmul.f32 0.6931472, %v1034_v37  ;;  %v372_v57 = vadd.f32 %v371_v20, %v370_v62  ;;  %v384_v2 = vadd.f32 %v383_v41, %v382_v11  ;;  %v378_v23 = vrot.slane %v377_v46, 1 }
  0x71   :  { %v110_v12 = vadd.f32 %v107_v42, %v104_v52  ;;  %v412_v32 = vrot.slane %v396_v50, %v957_v29 }
  0x72   :  { %v111_v21 = vadd.f32 %v109_v45, %v105_v58  ;;  %v385_v24 = vrot.slane %v384_v2, 1  ;;  %v397_v37 = vcombine.low %v365_v16, %v372_v57  ;;  %v379_v27 = vadd.f32 %v378_v23, %v377_v46 }
  0x73   :  { %v114_v25 = vsub.f32 %v110_v12, %v992_v55  ;;  %v427_v5 = vcombine.low %v405_v51, %v412_v32 }
  0x74   :  { %v115_v26 = vsub.f32 %v111_v21, %v113_v19  ;;  %v386_v28 = vadd.f32 %v385_v24, %v384_v2  ;;  %v419_v10 = vrot.slane %v397_v37, %v957_v29 }
  0x75   :  { %v619_v30 = vcombine.high %v114_v25, %v114_v25  ;;  %v626_v9 = vrot.slane %v114_v25, %v935_v6  ;;  %v435_v52 = vrot.slane %v427_v5, %v957_v29 }
  0x76   :  { %v636_v58 = vcombine.high %v115_v26, %v115_v26  ;;  %v643_v31 = vrot.slane %v115_v26, %v935_v6  ;;  %v398_v33 = vcombine.low %v379_v27, %v386_v28 }
  0x77   :  { %v633_v35 = vrot.slane %v619_v30, %v935_v6  ;;  %v634_v55 = vcombine.high %v626_v9, %v626_v9  ;;  %v661_v36 = vsel %vm165_vm0, %v626_v9, 0.0 }
  0x78   :  { %v650_v38 = vrot.slane %v636_v58, %v935_v6  ;;  %v651_v39 = vcombine.high %v643_v31, %v643_v31  ;;  %v662_v40 = vrot.slane %v661_v36, 4  ;;  %v689_v43 = vsel %vm165_vm0, %v643_v31, 0.0 }
  0x79   :  { %v426_v44 = vrot.slane %v398_v33, %v957_v29  ;;  %v635_v47 = vcombine.high %v633_v35, %v633_v35  ;;  %v668_v1 = vsel %vm165_vm0, %v634_v55, 0.0  ;;  %v675_v48 = vsel %vm165_vm0, %v633_v35, 0.0 }
  0x7a   :  { %v652_v14 = vcombine.high %v650_v38, %v650_v38  ;;  %v663_v49 = vadd.f32 %v662_v40, %v661_v36  ;;  %v669_v53 = vrot.slane %v668_v1, 4  ;;  %v676_v56 = vrot.slane %v675_v48, 4 }
  0x7b   :  { %v428_v59 = vcombine.low %v419_v10, %v426_v44  ;;  %v682_v60 = vsel %vm165_vm0, %v635_v47, 0.0  ;;  %v690_v61 = vrot.slane %v689_v43, 4  ;;  %v696_v6 = vsel %vm165_vm0, %v651_v39, 0.0 }
  0x7c   :  { %v664_v63 = vrot.slane %v663_v49, 2  ;;  %v670_v0 = vadd.f32 %v669_v53, %v668_v1  ;;  %v677_v3 = vadd.f32 %v676_v56, %v675_v48  ;;  %v683_v4 = vrot.slane %v682_v60, 4  ;;  %v614_v53 = vld [vmem:[#allocation7 + $0xc0] ss:$8 sm:$0xf] }
  0x7d   :  { %v442_v7 = vrot.slane %v428_v59, %v957_v29  ;;  %v691_v8 = vadd.f32 %v690_v61, %v689_v43  ;;  %v697_v13 = vrot.slane %v696_v6, 4  ;;  %v703_v62 = vsel %vm165_vm0, %v650_v38, 0.0  ;;  %v615_v56 = vld [vmem:[#allocation7 + $0xc0] ss:$8 sm:$0xf0] }
  0x7e   :  { %v665_v11 = vadd.f32 %v664_v63, %v663_v49  ;;  %v671_v34 = vrot.slane %v670_v0, 2  ;;  %v678_v15 = vrot.slane %v677_v3, 2  ;;  %v684_v16 = vadd.f32 %v683_v4, %v682_v60 }
  0x7f   :  { %v443_v17 = vcombine.low %v435_v52, %v442_v7  ;;  %v692_v19 = vrot.slane %v691_v8, 2  ;;  %v698_v20 = vadd.f32 %v697_v13, %v696_v6  ;;  %v704_v41 = vrot.slane %v703_v62, 4 }
  0x80   :  { %v666_v42 = vrot.slane %v665_v11, 1  ;;  %v672_v45 = vadd.f32 %v671_v34, %v670_v0  ;;  %v679_v46 = vadd.f32 %v678_v15, %v677_v3  ;;  %v685_v50 = vrot.slane %v684_v16, 2 }
  0x81   :  { %v445_v51 = vadd.f32 %v443_v17, %v286_v18  ;;  %v693_v54 = vadd.f32 %v692_v19, %v691_v8  ;;  %v699_v57 = vrot.slane %v698_v20, 2  ;;  %v705_v2 = vadd.f32 %v704_v41, %v703_v62 }
  0x82   :  { %v667_v12 = vadd.f32 %v666_v42, %v665_v11  ;;  %v673_v21 = vrot.slane %v672_v45, 1  ;;  %v680_v22 = vrot.slane %v679_v46, 1  ;;  %v686_v23 = vadd.f32 %v685_v50, %v684_v16 }
  0x83   :  { %446 = vst [vmem:[#allocation7 + $0x40] ss:$8 sm:$0xf] %v445_v51  ;;  %447 = vst [vmem:[#allocation7 + $0x40] ss:$8 sm:$0xf0] %v445_v51  ;;  %v700_v24 = vadd.f32 %v699_v57, %v698_v20  ;;  %v616_v61 = vor.u32 %v615_v56, %v614_v53 }
  0x84   :  { %v694_v32 = vrot.slane %v693_v54, 1  ;;  %v706_v37 = vrot.slane %v705_v2, 2  ;;  %v710_v25 = vsel %vm165_vm0, %v652_v14, 0.0  ;;  %v674_v26 = vadd.f32 %v673_v21, %v672_v45 }
  0x85   :  { %v681_v27 = vadd.f32 %v680_v22, %v679_v46  ;;  %v687_v5 = vrot.slane %v686_v23, 1  ;;  %v711_v28 = vrot.slane %v710_v25, 4  ;;  %v701_v30 = vrot.slane %v700_v24, 1 }
  0x86   :  { %v707_v18 = vadd.f32 %v706_v37, %v705_v2  ;;  %v695_v52 = vadd.f32 %v694_v32, %v693_v54  ;;  %v725_v58 = vcombine.low %v667_v12, %v674_v26 }
  0x87   :  { %v688_v9 = vadd.f32 %v687_v5, %v686_v23  ;;  %v712_v10 = vadd.f32 %v711_v28, %v710_v25  ;;  %v702_v31 = vadd.f32 %v701_v30, %v700_v24 }
  0x88   :  { %v708_v33 = vrot.slane %v707_v18, 1  ;;  %v735_v38 = vrot.slane %v725_v58, %v957_v29 }
  0x89   :  { %v713_v35 = vrot.slane %v712_v10, 2  ;;  %v726_v55 = vcombine.low %v681_v27, %v688_v9  ;;  %v727_v43 = vcombine.low %v695_v52, %v702_v31 }
  0x8a   :  { %v709_v39 = vadd.f32 %v708_v33, %v707_v18 }
  0x8b   :  { %v714_v36 = vadd.f32 %v713_v35, %v712_v10  ;;  %v742_v44 = vrot.slane %v726_v55, %v957_v29  ;;  %v749_v48 = vrot.slane %v727_v43, %v957_v29 }
  0x8d   :  { %v715_v40 = vrot.slane %v714_v36, 1  ;;  %v757_v14 = vcombine.low %v735_v38, %v742_v44 }
  0x8f   :  { %v716_v47 = vadd.f32 %v715_v40, %v714_v36  ;;  %v765_v60 = vrot.slane %v757_v14, %v957_v29 }
  0x91   :  { %v728_v1 = vcombine.low %v709_v39, %v716_v47 }
  0x93   :  { %v756_v49 = vrot.slane %v728_v1, %v957_v29 }
  0x95   :  { %v758_v59 = vcombine.low %v749_v48, %v756_v49 }
  0x97   :  { %v772_v6 = vrot.slane %v758_v59, %v957_v29 }
  0x99   :  { %v773_v63 = vcombine.low %v765_v60, %v772_v6 }
  0x9b   :  { %v775_v0 = vadd.f32 %v773_v63, %v616_v61 }
  0x9d   :  { %776 = vst [vmem:[#allocation7 + $0xc0] ss:$8 sm:$0xf] %v775_v0  ;;  %777 = vst [vmem:[#allocation7 + $0xc0] ss:$8 sm:$0xf0] %v775_v0 }
  0x9e   :  { %871 = shalt.err (!%p868_p6)
}
  0x9f   :  { %s872_s8 = scalar_lea.hbm %s1125_s2, 4096 }
  0xa0   :  { %p873_p7 = scmp.ne.s32.totalorder %s1125_s2, %s872_s8  ;;  %p876_p8 = scmp.lt.u32.totalorder %s872_s8, %s1125_s2 }
  0xa2   :  { %p878_p9 = pnand %p876_p8, %p873_p7 }
  0xa4   :  { %881 = shalt.err (!%p878_p9)
}
  0xa5   :  { %s894_s13 = smov 1024   ;;  %s895_s14 = smov 64  }
  0xa6   :  { %789 = dma.vmem_to_hbm [thread:$0]  %s784_s4, 4096, %s1125_s2, [#allocation4], %s894_s13, %s894_s13, %s895_s14  }
  0xa7   :  { %886 = dma.done.wait [#allocation4], 4096  }
  0xa8   :  { %887 = vsyncadd [#allocation4], 4294963200 }
  0xa9   :  { %793 = vsyncpa [#allocation3], 1 }
  0xaa   :  { %794 = vsyncpa [#allocation6], 1 }
  0xab   :  { %795 = vsyncpa [#allocation4], 1 }

</bundles_post_ra>
